<compile_context>
chip_gen: v7x
topology: tpu7x:2x2x1
jax: 0.10.0
libtpu: 0.0.40
codegen_flags: <defaults>
</compile_context>

<pallas_src>
import functools

import jax
import jax.numpy as jnp
from jax.experimental import pallas as pl
from jax.experimental.pallas import tpu as pltpu


LANE = 128
_MIN_VMEM_BYTES = 16 * 1024 * 1024
_MAX_VMEM_BYTES = 48 * 1024 * 1024   # safe on v7x (64 MiB physical VMEM)


def _round_up(x, m):
    return ((x + m - 1) // m) * m


def _pick_tile(dim_padded, preferred):
    """Largest multiple of 128 that divides dim_padded and is <= preferred."""
    t = min(preferred, dim_padded)
    while dim_padded % t:
        t -= LANE
    return t


def _vmem_limit(estimate_bytes):
    return int(min(_MAX_VMEM_BYTES, max(_MIN_VMEM_BYTES, 4 * estimate_bytes)))


# --------------------------- Pallas kernel bodies --------------------------- #
def _xw_kernel(x_ref, w_ref, o_ref, acc_ref):
    """XW tile accumulator: acc += X_tile @ W_tile; write on last k step."""
    k = pl.program_id(2)

    @pl.when(k == 0)
    def _():
        acc_ref[...] = jnp.zeros_like(acc_ref)

    acc_ref[...] += jnp.dot(x_ref[...], w_ref[...],
                            preferred_element_type=jnp.float32)

    @pl.when(k == pl.num_programs(2) - 1)
    def _():
        o_ref[...] = acc_ref[...].astype(o_ref.dtype)


def _agg_kernel(a_ref, xw_ref, b_ref, o_ref, acc_ref, *, apply_relu):
    """Aggregation tile accumulator: acc += A_tile @ XW_tile; bias+ReLU on finalize."""
    k = pl.program_id(2)

    @pl.when(k == 0)
    def _():
        acc_ref[...] = jnp.zeros_like(acc_ref)

    acc_ref[...] += jnp.dot(a_ref[...], xw_ref[...],
                            preferred_element_type=jnp.float32)

    @pl.when(k == pl.num_programs(2) - 1)
    def _():
        out = acc_ref[...] + b_ref[...]          # b is (1, tn), broadcasts over rows
        if apply_relu:
            out = jnp.maximum(out, 0.0)
        o_ref[...] = out.astype(o_ref.dtype)


# ------------------------------ kernel wrappers ------------------------------ #
def feature_transform(x_bf16, w_bf16, *, tm=256, tn=256, tk=512):
    """XW = X @ W, tiled matmul. x: (M, K) bf16, w: (K, N) bf16 -> (M, N) bf16."""
    M, K = x_bf16.shape
    _, N = w_bf16.shape
    tm = _pick_tile(M, tm)
    tn = _pick_tile(N, tn)
    tk = _pick_tile(K, tk)
    grid = (M // tm, N // tn, K // tk)
    vmem = _vmem_limit(2 * (tm * tk * 2 + tk * tn * 2 + tm * tn * 2) + tm * tn * 4)
    return pl.pallas_call(
        _xw_kernel,
        out_shape=jax.ShapeDtypeStruct((M, N), jnp.bfloat16),
        grid_spec=pltpu.PrefetchScalarGridSpec(
            num_scalar_prefetch=0,
            grid=grid,
            in_specs=[
                pl.BlockSpec((tm, tk), lambda i, j, k: (i, k)),
                pl.BlockSpec((tk, tn), lambda i, j, k: (k, j)),
            ],
            out_specs=pl.BlockSpec((tm, tn), lambda i, j, k: (i, j)),
            scratch_shapes=[pltpu.VMEM((tm, tn), jnp.float32)],
        ),
        compiler_params=pltpu.CompilerParams(
            dimension_semantics=("parallel", "parallel", "arbitrary"),
            vmem_limit_bytes=vmem),
        cost_estimate=pl.CostEstimate(
            flops=2 * M * K * N,
            transcendentals=0,
            bytes_accessed=M * K * 2 + K * N * 2 + M * N * 2),
    )(x_bf16, w_bf16)


def aggregate(a_bf16, xw_bf16, b_f32, *, apply_relu, tm=256, tn=256, tk=512):
    """relu(A_hat @ XW + b). a: (M, K) bf16, xw: (K, N) bf16, b: (1, N) f32 -> (M, N) f32."""
    M, K = a_bf16.shape
    _, N = xw_bf16.shape
    tm = _pick_tile(M, tm)
    tn = _pick_tile(N, tn)
    tk = _pick_tile(K, tk)
    grid = (M // tm, N // tn, K // tk)
    vmem = _vmem_limit(
        2 * (tm * tk * 2 + tk * tn * 2 + tm * tn * 4 + tn * 4) + tm * tn * 4)
    kernel = functools.partial(_agg_kernel, apply_relu=apply_relu)
    return pl.pallas_call(
        kernel,
        out_shape=jax.ShapeDtypeStruct((M, N), jnp.float32),
        grid_spec=pltpu.PrefetchScalarGridSpec(
            num_scalar_prefetch=0,
            grid=grid,
            in_specs=[
                pl.BlockSpec((tm, tk), lambda i, j, k: (i, k)),
                pl.BlockSpec((tk, tn), lambda i, j, k: (k, j)),
                pl.BlockSpec((1, tn), lambda i, j, k: (0, j)),
            ],
            out_specs=pl.BlockSpec((tm, tn), lambda i, j, k: (i, j)),
            scratch_shapes=[pltpu.VMEM((tm, tn), jnp.float32)],
        ),
        compiler_params=pltpu.CompilerParams(
            dimension_semantics=("parallel", "parallel", "arbitrary"),
            vmem_limit_bytes=vmem),
        cost_estimate=pl.CostEstimate(
            flops=2 * M * K * N,
            transcendentals=0,
            bytes_accessed=M * K * 2 + K * N * 2 + N * 4 + M * N * 4),
    )(a_bf16, xw_bf16, b_f32)


# --------------------------- JAX glue (gcn_norm) ---------------------------- #
def build_norm_adj(edge_index, edge_weight, num_nodes):
    """Dense A_hat such that out = A_hat @ x matches PyG GCNConv propagation
    (add self-loops, symmetric D^-1/2 normalization)."""
    row, col = edge_index[0], edge_index[1]
    if edge_weight is None:
        edge_weight = jnp.ones(row.shape[0], dtype=jnp.float32)
    loop = jnp.arange(num_nodes, dtype=edge_index.dtype)
    row = jnp.concatenate([row, loop])
    col = jnp.concatenate([col, loop])
    ew = jnp.concatenate([edge_weight.astype(jnp.float32),
                          jnp.ones(num_nodes, jnp.float32)])
    # degree computed on target nodes (col), as in torch_geometric.gcn_norm
    deg = jnp.zeros(num_nodes, jnp.float32).at[col].add(ew)
    dis = jnp.where(deg > 0, 1.0 / jnp.sqrt(deg), 0.0)
    norm = dis[row] * ew * dis[col]
    m = jnp.zeros((num_nodes, num_nodes), jnp.float32).at[row, col].add(norm)
    # out[target] = sum_{(src->target)} norm * x[src]  =>  A_hat = m^T
    return m.T


# ------------------------------ GCN_gen model ------------------------------- #
class GCNGenPallas:
    def __init__(self, in_channels, hidden_channels, out_channels, num_layers, key):
        self.out_channels = out_channels
        self.weights = []   # padded to (Fin_pad, Fout_pad), bf16
        self.biases = []    # padded to (1, Fout_pad), f32
        for i in range(num_layers):
            fin = in_channels if i == 0 else hidden_channels
            fout = out_channels if i == num_layers - 1 else hidden_channels
            key, sub = jax.random.split(key)
            limit = jnp.sqrt(6.0 / (fin + fout))          # glorot uniform (PyG default)
            w = jax.random.uniform(sub, (fin, fout), jnp.float32, -limit, limit)
            b = jnp.zeros((1, fout), jnp.float32)          # PyG GCNConv bias init: zeros
            fin_p = _round_up(fin, LANE)
            fout_p = _round_up(fout, LANE)
            w_p = jnp.zeros((fin_p, fout_p), jnp.float32).at[:fin, :fout].set(w)
            b_p = jnp.zeros((1, fout_p), jnp.float32).at[:, :fout].set(b)
            self.weights.append(w_p.astype(jnp.bfloat16))
            self.biases.append(b_p)

    def __call__(self, x, edge_index, edge_weight=None):
        n, fin = x.shape
        n_pad = _round_up(n, LANE)
        fin_pad = _round_up(fin, LANE)

        a_weighted = build_norm_adj(edge_index, edge_weight, n)
        # last conv is called WITHOUT edge_weight in the reference forward
        if edge_weight is None:
            a_unweighted = a_weighted
        else:
            a_unweighted = build_norm_adj(edge_index, None, n)

        def pad_a(a):
            return jnp.pad(a, ((0, n_pad - n), (0, n_pad - n))).astype(jnp.bfloat16)

        a_w = pad_a(a_weighted)
        a_u = pad_a(a_unweighted)

        # Padded node features stay zero in the padded feature columns; padded
        # node rows never contaminate real rows because A_hat's padded columns
        # are zero. Final result is sliced back to (n, out_channels).
        xp = jnp.pad(x, ((0, n_pad - n), (0, fin_pad - fin))).astype(jnp.bfloat16)

        num_layers = len(self.weights)
        out = None
        for i in range(num_layers):
            last = i == num_layers - 1
            a = a_u if last else a_w
            xw = feature_transform(xp, self.weights[i])
            out = aggregate(a, xw, self.biases[i], apply_relu=not last)
            xp = out.astype(jnp.bfloat16)
        return out[:n, :self.out_channels]


# ----------------------------------- main ----------------------------------- #
if __name__ == "__main__":
    key = jax.random.PRNGKey(0)
    k_feat, k_edge, k_ew, k_params = jax.random.split(key, 4)

    num_nodes = 16
    in_channels = 8
    hidden_channels = 32
    out_channels = 4
    num_layers = 3
    num_edges = 40

    x = jax.random.normal(k_feat, (num_nodes, in_channels), jnp.float32)
    edge_index = jax.random.randint(k_edge, (2, num_edges), 0, num_nodes,
                                    dtype=jnp.int32)
    edge_weight = jax.random.uniform(k_ew, (num_edges,), jnp.float32, 0.1, 1.0)

    model = GCNGenPallas(in_channels, hidden_channels, out_channels,
                         num_layers, k_params)

    out = model(x, edge_index, edge_weight)
    out = jax.block_until_ready(out)
    assert out.shape == (num_nodes, out_channels)
    assert bool(jnp.all(jnp.isfinite(out)))
    print("KERNEL_OK")
</pallas_src>

<mosaic_0001>
module attributes {stable_mosaic.version = 11 : i64} {
  func.func @_xw_kernel(%arg0: i32, %arg1: i32, %arg2: i32, %arg3: memref<128x128xbf16, #tpu.memory_space<vmem>>, %arg4: memref<128x128xbf16, #tpu.memory_space<vmem>>, %arg5: memref<128x128xbf16, #tpu.memory_space<vmem>>, %arg6: memref<128x128xf32, #tpu.memory_space<vmem>>) attributes {dimension_semantics = [#tpu.dimension_semantics<parallel>, #tpu.dimension_semantics<parallel>, #tpu.dimension_semantics<arbitrary>], iteration_bounds = array<i64: 1, 1, 1>, scalar_prefetch = 0 : i64, scratch_operands = 1 : i64, tpu.core_type = #tpu.core_type<tc>, window_params = [{transform_indices = @transform_0, window_bounds = array<i64: 128, 128>}, {transform_indices = @transform_1, window_bounds = array<i64: 128, 128>}, {transform_indices = @transform_2, window_bounds = array<i64: 128, 128>}]} {
    %c0_i32 = arith.constant 0 : i32
    %0 = arith.cmpi eq, %arg2, %c0_i32 : i32
    %1 = arith.extui %0 : i1 to i32
    %c0_i32_0 = arith.constant 0 : i32
    %2 = arith.cmpi ne, %1, %c0_i32_0 : i32
    scf.if %2 {
      %cst_10 = arith.constant 0.000000e+00 : f32
      %12 = vector.broadcast %cst_10 : f32 to vector<128x128xf32>
      %c0_11 = arith.constant 0 : index
      %c0_12 = arith.constant 0 : index
      %13 = vector.load %arg6[%c0_11, %c0_12] : memref<128x128xf32, #tpu.memory_space<vmem>>, vector<128x128xf32>
      tpu.vector_store %arg6[%c0_11, %c0_12], %12 {strides = array<i32>} : memref<128x128xf32, #tpu.memory_space<vmem>>, vector<128x128xf32>,
    } else {
    }
    %c0 = arith.constant 0 : index
    %c0_1 = arith.constant 0 : index
    %3 = vector.load %arg6[%c0, %c0_1] : memref<128x128xf32, #tpu.memory_space<vmem>>, vector<128x128xf32>
    %c0_2 = arith.constant 0 : index
    %c0_3 = arith.constant 0 : index
    %4 = vector.load %arg3[%c0_2, %c0_3] : memref<128x128xbf16, #tpu.memory_space<vmem>>, vector<128x128xbf16>
    %c0_4 = arith.constant 0 : index
    %c0_5 = arith.constant 0 : index
    %5 = vector.load %arg4[%c0_4, %c0_5] : memref<128x128xbf16, #tpu.memory_space<vmem>>, vector<128x128xbf16>
    %cst = arith.constant dense<0.000000e+00> : vector<128x128xf32>
    %6 = tpu.matmul %4, %5, %cst {dimension_numbers = #tpu.dot_dimension_numbers<[1], [0], [0], [1], [0, 0, 1, 1], [], []>} : vector<128x128xbf16>, vector<128x128xbf16>, vector<128x128xf32> -> vector<128x128xf32>
    %7 = arith.addf %3, %6 : vector<128x128xf32>
    %c0_6 = arith.constant 0 : index
    %c0_7 = arith.constant 0 : index
    %8 = vector.load %arg6[%c0_6, %c0_7] : memref<128x128xf32, #tpu.memory_space<vmem>>, vector<128x128xf32>
    tpu.vector_store %arg6[%c0_6, %c0_7], %7 {strides = array<i32>} : memref<128x128xf32, #tpu.memory_space<vmem>>, vector<128x128xf32>,
    %c0_i32_8 = arith.constant 0 : i32
    %9 = arith.cmpi eq, %arg2, %c0_i32_8 : i32
    %10 = arith.extui %9 : i1 to i32
    %c0_i32_9 = arith.constant 0 : i32
    %11 = arith.cmpi ne, %10, %c0_i32_9 : i32
    scf.if %11 {
      %c0_10 = arith.constant 0 : index
      %c0_11 = arith.constant 0 : index
      %12 = vector.load %arg6[%c0_10, %c0_11] : memref<128x128xf32, #tpu.memory_space<vmem>>, vector<128x128xf32>
      %13 = arith.truncf %12 : vector<128x128xf32> to vector<128x128xbf16>
      %c0_12 = arith.constant 0 : index
      %c0_13 = arith.constant 0 : index
      %14 = vector.load %arg5[%c0_12, %c0_13] : memref<128x128xbf16, #tpu.memory_space<vmem>>, vector<128x128xbf16>
      tpu.vector_store %arg5[%c0_12, %c0_13], %13 {strides = array<i32>} : memref<128x128xbf16, #tpu.memory_space<vmem>>, vector<128x128xbf16>,
    } else {
    }
    return
  }
  func.func @transform_0(%arg0: i32, %arg1: i32, %arg2: i32) -> (i32, i32) {
    %c0_i32 = arith.constant 0 : i32
    return %arg0, %arg2 : i32, i32
  }
  func.func @transform_1(%arg0: i32, %arg1: i32, %arg2: i32) -> (i32, i32) {
    %c0_i32 = arith.constant 0 : i32
    return %arg2, %arg1 : i32, i32
  }
  func.func @transform_2(%arg0: i32, %arg1: i32, %arg2: i32) -> (i32, i32) {
    %c0_i32 = arith.constant 0 : i32
    return %arg0, %arg1 : i32, i32
  }
}

</mosaic_0001>

<bundles_post_ra>
// kernel: tpu_custom_call.1
= control target key start
LH: loop header
LB: loop body
LE: loop exit
PB: predicated region body
PF: predicated region fallthrough
CT: control target
= control target key end

     0   :  { %7 = vsyncpa [#allocation4], 0  ;;  %s768_s0 = inlined_call_operand.hbm [shape: bf16[128,128], index: 0, kind: input, shape index: {}]   ;;  %s769_s1 = inlined_call_operand.hbm [shape: bf16[128,128], index: 1, kind: input, shape index: {}]   ;;  %s770_s2 = inlined_call_operand.hbm [shape: bf16[128,128], index: 2, kind: output, shape index: {}]  }
   0x1   :  { %8 = vsyncpa [#allocation7], 0 }
   0x2   :  { %9 = vsyncpa [#allocation5], 0  ;;  %s703_s9 = smov [#allocation3]   ;;  %s631_s13 = scalar_lea.hbm %s768_s0, 1024 }
   0x3   :  { %s15_s10 = sshll.u32 %s703_s9, 4  ;;  %p632_p0 = scmp.ne.s32.totalorder %s768_s0, %s631_s13  ;;  %s16_s10 = int_to_ptr.vmem [resolvable:$true] %s15_s10 }
   0x4   :  { %p635_p1 = scmp.lt.u32.totalorder %s631_s13, %s768_s0 }
   0x6   :  { %p637_p2 = pnand %p635_p1, %p632_p0 }
   0x8   :  { %640 = shalt.err (!%p637_p2)
}
   0x9   :  { %s641_s18 = scalar_lea.vmem %s16_s10, 1024  ;;  %p646_p4 = scmp.lt.s32.totalorder %s16_s10, %s16_s10 }
   0xa   :  { %p642_p3 = scmp.ne.s32.totalorder %s16_s10, %s641_s18  ;;  %p647_p5 = scmp.lt.s32.totalorder %s641_s18, %s641_s18 }
   0xc   :  { %p648_p6 = por %p647_p5, %p646_p4 }
   0xe   :  { %p649_p7 = pnand %p648_p6, %p642_p3 }
  0x10   :  { %652 = shalt.err (!%p649_p7)
}
  0x11   :  { %s704_s19 = smov 64   ;;  %s705_s20 = smov 4  }
  0x12   :  { %21 = dma.hbm_to_vmem [thread:$0]  %s768_s0, 1024, %s16_s10, [#allocation4], %s704_s19, %s704_s19, %s705_s20  }
  0x13   :  { %s706_s23 = smov [#allocation6]   ;;  %s653_s27 = scalar_lea.hbm %s769_s1, 1024 }
  0x14   :  { %s27_s24 = sshll.u32 %s706_s23, 4  ;;  %p654_p8 = scmp.ne.s32.totalorder %s769_s1, %s653_s27  ;;  %s28_s24 = int_to_ptr.vmem [resolvable:$true] %s27_s24 }
  0x15   :  { %p657_p9 = scmp.lt.u32.totalorder %s653_s27, %s769_s1 }
  0x17   :  { %p659_p10 = pnand %p657_p9, %p654_p8 }
  0x19   :  { %662 = shalt.err (!%p659_p10)
}
  0x1a   :  { %s663_s4 = scalar_lea.vmem %s28_s24, 1024  ;;  %p668_p12 = scmp.lt.s32.totalorder %s28_s24, %s28_s24 }
  0x1b   :  { %p664_p11 = scmp.ne.s32.totalorder %s28_s24, %s663_s4  ;;  %p669_p13 = scmp.lt.s32.totalorder %s663_s4, %s663_s4 }
  0x1d   :  { %p670_p0 = por %p669_p13, %p668_p12 }
  0x1f   :  { %p671_p1 = pnand %p670_p0, %p664_p11 }
  0x21   :  { %674 = shalt.err (!%p671_p1)
}
  0x22   :  { %33 = dma.hbm_to_vmem [thread:$0]  %s769_s1, 1024, %s28_s24, [#allocation7], %s704_s19, %s704_s19, %s705_s20  }
  0x23   :  { %697 = dma.done.wait [#allocation4], 1024  }
  0x24   :  { %698 = vsyncadd [#allocation4], 4294966272 }
  0x25   :  { %699 = dma.done.wait [#allocation7], 1024  }
  0x26   :  { %700 = vsyncadd [#allocation7], 4294966272  ;;  %v615_v0 = vld [vmem:[#allocation6] sm:$0xff]   ;;  %v616_v1 = vld [vmem:[#allocation6 + $0x8] sm:$0xff]   ;;  %s707_s1 = smov [#allocation8]  }
  0x27   :  { %562 = vmatprep.subr.bf16.mxu0 %v615_v0  ;;  %594 = vmatprep.subr.bf16.mxu1 %v615_v0  ;;  %v617_v2 = vld [vmem:[#allocation6 + $0x10] sm:$0xff]   ;;  %v618_v3 = vld [vmem:[#allocation6 + $0x18] sm:$0xff]   ;;  %v623_v4 = vld [vmem:[#allocation3] sm:$0xff]   ;;  %s438_s6 = sshll.u32 %s707_s1, 4  ;;  %s439_s6 = int_to_ptr.vmem [resolvable:$true] %s438_s6 }
  0x28   :  { %563 = vmatpush3.bf16.msra.mxu0 %v615_v0  ;;  %602 = vmatpush3.bf16.msra.mxu1 %v615_v0  ;;  %v624_v5 = vld [vmem:[#allocation3 + $0x20] sm:$0xff]   ;;  %v620_v7 = vld [vmem:[#allocation6 + $0x28] sm:$0xff]   ;;  %v621_v8 = vld [vmem:[#allocation6 + $0x30] sm:$0xff]   ;;  %s675_s7 = scalar_lea.vmem %s439_s6, 1024  ;;  %p680_p3 = scmp.lt.s32.totalorder %s439_s6, %s439_s6 }
  0x29   :  { %564 = vmatprep.subr.bf16.mxu0 %v616_v1  ;;  %595 = vmatprep.subr.bf16.mxu1 %v616_v1  ;;  %v619_v6 = vld [vmem:[#allocation6 + $0x20] sm:$0xff]   ;;  %v622_v9 = vld [vmem:[#allocation6 + $0x38] sm:$0xff]   ;;  %v625_v10 = vld [vmem:[#allocation3 + $0x8] sm:$0xff]   ;;  %p676_p2 = scmp.ne.s32.totalorder %s439_s6, %s675_s7  ;;  %p681_p4 = scmp.lt.s32.totalorder %s675_s7, %s675_s7 }
  0x2a   :  { %578 = vmatprep.mubr.bf16.mxu0 %v623_v4  ;;  %586 = vmatprep.mubr.bf16.mxu1 %v624_v5  ;;  %v626_v11 = vld [vmem:[#allocation3 + $0x28] sm:$0xff]   ;;  %v627_v12 = vld [vmem:[#allocation3 + $0x10] sm:$0xff]   ;;  %v629_v14 = vld [vmem:[#allocation3 + $0x18] sm:$0xff]  }
  0x2b   :  { %v628_v13 = vld [vmem:[#allocation3 + $0x30] sm:$0xff]   ;;  %v630_v15 = vld [vmem:[#allocation3 + $0x38] sm:$0xff]   ;;  %p682_p5 = por %p681_p4, %p680_p3 }
  0x2c   :  { %565 = vmatpush3.bf16.msra.mxu0 %v616_v1  ;;  %603 = vmatpush3.bf16.msra.mxu1 %v616_v1 }
  0x2d   :  { %566 = vmatprep.subr.bf16.mxu0 %v617_v2  ;;  %596 = vmatprep.subr.bf16.mxu1 %v617_v2  ;;  %p683_p6 = pnand %p682_p5, %p676_p2 }
  0x30   :  { %567 = vmatpush3.bf16.msra.mxu0 %v617_v2  ;;  %604 = vmatpush3.bf16.msra.mxu1 %v617_v2 }
  0x31   :  { %568 = vmatprep.subr.bf16.mxu0 %v618_v3  ;;  %597 = vmatprep.subr.bf16.mxu1 %v618_v3 }
  0x34   :  { %569 = vmatpush3.bf16.msra.mxu0 %v618_v3  ;;  %605 = vmatpush3.bf16.msra.mxu1 %v618_v3 }
  0x35   :  { %570 = vmatprep.subr.bf16.mxu0 %v619_v6  ;;  %598 = vmatprep.subr.bf16.mxu1 %v619_v6 }
  0x38   :  { %571 = vmatpush3.bf16.msra.mxu0 %v619_v6  ;;  %606 = vmatpush3.bf16.msra.mxu1 %v619_v6 }
  0x39   :  { %572 = vmatprep.subr.bf16.mxu0 %v620_v7  ;;  %599 = vmatprep.subr.bf16.mxu1 %v620_v7 }
  0x3c   :  { %573 = vmatpush3.bf16.msra.mxu0 %v620_v7  ;;  %607 = vmatpush3.bf16.msra.mxu1 %v620_v7 }
  0x3d   :  { %574 = vmatprep.subr.bf16.mxu0 %v621_v8  ;;  %600 = vmatprep.subr.bf16.mxu1 %v621_v8 }
  0x40   :  { %575 = vmatpush3.bf16.msra.mxu0 %v621_v8  ;;  %608 = vmatpush3.bf16.msra.mxu1 %v621_v8 }
  0x41   :  { %576 = vmatprep.subr.bf16.mxu0 %v622_v9  ;;  %601 = vmatprep.subr.bf16.mxu1 %v622_v9 }
  0x44   :  { %577 = vmatpush3.bf16.msra.mxu0 %v622_v9  ;;  %609 = vmatpush3.bf16.msra.mxu1 %v622_v9 }
  0x47   :  { %579 = vmatmul.mubr.bf16.vlgmr.msra.gmra.mrb[0].mxu0 %v625_v10  ;;  %587 = vmatmul.mubr.bf16.vlgmr.msra.gmra.mrb[0].mxu1 %v626_v11 }
  0x48   :  { %582 = vmatprep.mubr.bf16.mxu0 %v627_v12  ;;  %590 = vmatprep.mubr.bf16.mxu1 %v628_v13 }
  0x4f   :  { %583 = vmatmul.mubr.bf16.gmra.mrb[4].mxu0 %v629_v14  ;;  %591 = vmatmul.mubr.bf16.gmra.mrb[4].mxu1 %v630_v15 }
 0x11a   :  { %v580_v16 = vpop.f32.mrb[0].mxu0  ;;  %v588_v17 = vpop.f32.mrb[0].mxu1 }
 0x11b   :  { %v239_v18 = vpop.f32.mrb[1].mxu0  ;;  %v271_v19 = vpop.f32.mrb[1].mxu1 }
 0x11c   :  { %v581_v20 = vpop.f32.mrb[2].mxu0  ;;  %v589_v21 = vpop.f32.mrb[2].mxu1 }
 0x11d   :  { %v507_v22 = vpack.c.bf16 %v581_v20, %v580_v16  ;;  %v527_v23 = vpack.c.bf16 %v589_v21, %v588_v17  ;;  %v242_v24 = vpop.f32.mrb[3].mxu0  ;;  %v274_v25 = vpop.f32.mrb[3].mxu1 }
 0x11e   :  { %v502_v26 = vpack.c.bf16 %v242_v24, %v239_v18  ;;  %v522_v27 = vpack.c.bf16 %v274_v25, %v271_v19 }
 0x11f   :  { %539 = vst [vmem:[#allocation8 + $0x8] sm:$0xff] %v507_v22   ;;  %543 = vst [vmem:[#allocation8 + $0x28] sm:$0xff] %v527_v23  }
 0x120   :  { %503 = vst [vmem:[#allocation8] sm:$0xff] %v502_v26   ;;  %542 = vst [vmem:[#allocation8 + $0x20] sm:$0xff] %v522_v27  }
 0x122   :  { %v584_v28 = vpop.f32.mrb[4].mxu0  ;;  %v592_v29 = vpop.f32.mrb[4].mxu1 }
 0x123   :  { %v255_v30 = vpop.f32.mrb[5].mxu0  ;;  %v287_v31 = vpop.f32.mrb[5].mxu1 }
 0x124   :  { %v585_v32 = vpop.f32.mrb[6].mxu0  ;;  %v593_v33 = vpop.f32.mrb[6].mxu1 }
 0x125   :  { %v517_v34 = vpack.c.bf16 %v585_v32, %v584_v28  ;;  %v537_v35 = vpack.c.bf16 %v593_v33, %v592_v29  ;;  %v258_v36 = vpop.f32.mrb[7].mxu0  ;;  %v290_v37 = vpop.f32.mrb[7].mxu1 }
 0x126   :  { %v512_v38 = vpack.c.bf16 %v258_v36, %v255_v30  ;;  %v532_v39 = vpack.c.bf16 %v290_v37, %v287_v31 }
 0x127   :  { %541 = vst [vmem:[#allocation8 + $0x18] sm:$0xff] %v517_v34   ;;  %545 = vst [vmem:[#allocation8 + $0x38] sm:$0xff] %v537_v35  }
 0x128   :  { %540 = vst [vmem:[#allocation8 + $0x10] sm:$0xff] %v512_v38   ;;  %544 = vst [vmem:[#allocation8 + $0x30] sm:$0xff] %v532_v39  }
 0x129   :  { %686 = shalt.err (!%p683_p6)
}
 0x12a   :  { %s687_s10 = scalar_lea.hbm %s770_s2, 1024 }
 0x12b   :  { %p688_p7 = scmp.ne.s32.totalorder %s770_s2, %s687_s10  ;;  %p691_p8 = scmp.lt.u32.totalorder %s687_s10, %s770_s2 }
 0x12d   :  { %p693_p9 = pnand %p691_p8, %p688_p7 }
 0x12f   :  { %696 = shalt.err (!%p693_p9)
}
 0x130   :  { %444 = dma.vmem_to_hbm [thread:$0]  %s439_s6, 1024, %s770_s2, [#allocation5], %s704_s19, %s704_s19, %s705_s20  }
 0x131   :  { %701 = dma.done.wait [#allocation5], 1024  }
 0x132   :  { %702 = vsyncadd [#allocation5], 4294966272 }
 0x133   :  { %448 = vsyncpa [#allocation4], 1 }
 0x134   :  { %449 = vsyncpa [#allocation7], 1 }
 0x135   :  { %450 = vsyncpa [#allocation5], 1 }

</bundles_post_ra>
